<compile_context>
chip_gen: v7x
topology: tpu7x:2x2x1
jax: 0.10.0
libtpu: 0.0.40
codegen_flags: <defaults>
</compile_context>

<pallas_src>
import jax
import jax.numpy as jnp
from jax import lax
from jax.experimental import pallas as pl
from jax.experimental.pallas import tpu as pltpu


def _mlp_kernel(x_ref, w1_ref, b1_ref, w2_ref, b2_ref, w3_ref, b3_ref, o_ref):
    # x tile: (TB, 256) in its native dtype; cast to bf16 for the MXU here
    # (free VPU work in a bandwidth-bound kernel).
    x = x_ref[...].astype(jnp.bfloat16)

    # Layer 1: MXU bf16 x bf16 -> f32 accumulate; bias + relu in f32 (VPU).
    h1 = jnp.dot(x, w1_ref[...], preferred_element_type=jnp.float32)     # (TB, 64)
    h1 = jnp.maximum(h1 + b1_ref[...], 0.0)

    # Layer 2.
    h2 = jnp.dot(h1.astype(jnp.bfloat16), w2_ref[...],
                 preferred_element_type=jnp.float32)                     # (TB, 64)
    h2 = jnp.maximum(h2 + b2_ref[...], 0.0)

    # Layer 3 (64 -> 1), produced lane-dense: w3 is padded to (8, 64) with the
    # real weights in row 0; contract against h2's feature dim so the MXU
    # emits an (8, TB) block with batch on the lane axis.  Row 0 is the result.
    z8 = lax.dot_general(w3_ref[...], h2.astype(jnp.bfloat16),
                         dimension_numbers=(((1,), (1,)), ((), ())),
                         preferred_element_type=jnp.float32)             # (8, TB)
    z = z8[0:1, :] + b3_ref[0]                                           # (1, TB)

    # Exact sigmoid: exp on EUP + exact reciprocal (plenty of EUP slack).
    o_ref[...] = pl.reciprocal(1.0 + jnp.exp(-z), approx=False)


def _round_up(n, m):
    return ((n + m - 1) // m) * m


def discriminator_forward(x, params, tb=4096):
    """x: (B, 256) float32 (or bfloat16).  params: dict of (in, out) weights."""
    B, D = x.shape
    assert D == 256

    # Tile choice: one (sublane-aligned) tile if the batch fits, otherwise
    # tb-row tiles with a ragged last block (no padding pass over x).
    if B <= tb:
        tb_eff = _round_up(max(B, 1), 8)
    else:
        assert tb % 128 == 0, "tb must be a multiple of 128 when tiling the batch"
        tb_eff = tb
    grid_b = pl.cdiv(B, tb_eff)
    Bp = grid_b * tb_eff          # logical padded batch (output lanes; never materialized for x)

    # Tiny, VMEM-resident operands (one-time ~70 KiB of HBM traffic).
    w1 = params["w1"].astype(jnp.bfloat16)                       # (256, 64)
    w2 = params["w2"].astype(jnp.bfloat16)                       # (64, 64)
    b1 = params["b1"].astype(jnp.float32)                        # (1, 64)
    b2 = params["b2"].astype(jnp.float32)                        # (1, 64)
    w3 = jnp.zeros((8, 64), jnp.float32).at[0].set(
        params["w3"].reshape(64)).astype(jnp.bfloat16)           # (8, 64), row 0 real
    b3 = params["b3"].reshape(1).astype(jnp.float32)             # (1,) scalar in SMEM

    out = pl.pallas_call(
        _mlp_kernel,
        out_shape=jax.ShapeDtypeStruct((1, Bp), jnp.float32),    # lane-dense output
        grid=(grid_b,),
        in_specs=[
            pl.BlockSpec((tb_eff, 256), lambda i: (i, 0)),       # x: streamed tiles
            pl.BlockSpec((256, 64), lambda i: (0, 0)),           # w1: resident
            pl.BlockSpec((1, 64), lambda i: (0, 0)),             # b1: resident
            pl.BlockSpec((64, 64), lambda i: (0, 0)),            # w2: resident
            pl.BlockSpec((1, 64), lambda i: (0, 0)),             # b2: resident
            pl.BlockSpec((8, 64), lambda i: (0, 0)),             # w3 (padded): resident
            pl.BlockSpec(memory_space=pltpu.MemorySpace.SMEM),   # b3 scalar
        ],
        out_specs=pl.BlockSpec((1, tb_eff), lambda i: (0, i)),
        compiler_params=pltpu.CompilerParams(
            dimension_semantics=("parallel",),                   # megacore-friendly
            vmem_limit_bytes=32 * 1024 * 1024,                   # headroom for f32 x tiles on v5e
        ),
    )(x, w1, b1, w2, b2, w3, b3)

    # Drop ragged-tail garbage columns; present (B, 1) like the PyTorch module.
    return out[0, :B][:, None]


def init_params(key):
    """Deterministic init matching nn.Linear shapes (stored as (in, out))."""
    k1, k2, k3, k4, k5, k6 = jax.random.split(key, 6)

    def linear_init(kw, kb, fan_in, fan_out):
        # PyTorch default: U(-1/sqrt(fan_in), 1/sqrt(fan_in))
        bound = 1.0 / jnp.sqrt(jnp.float32(fan_in))
        w = jax.random.uniform(kw, (fan_in, fan_out), jnp.float32, -bound, bound)
        b = jax.random.uniform(kb, (1, fan_out), jnp.float32, -bound, bound)
        return w, b

    w1, b1 = linear_init(k1, k2, 256, 64)
    w2, b2 = linear_init(k3, k4, 64, 64)
    w3, b3 = linear_init(k5, k6, 64, 1)
    return {"w1": w1, "b1": b1, "w2": w2, "b2": b2, "w3": w3, "b3": b3}


def reference_forward(x, p):
    h = jnp.maximum(x @ p["w1"] + p["b1"], 0.0)
    h = jnp.maximum(h @ p["w2"] + p["b2"], 0.0)
    return jax.nn.sigmoid(h @ p["w3"] + p["b3"])


if __name__ == "__main__":
    key = jax.random.PRNGKey(0)
    kx, kp = jax.random.split(key)
    params = init_params(kp)

    # Main small case (aligned batch, single tile).
    B = 8
    x = jax.random.normal(kx, (B, 256), jnp.float32)
    out = jax.block_until_ready(discriminator_forward(x, params))
    ref = reference_forward(x, params)
    assert out.shape == (B, 1)
    assert jnp.allclose(out, ref, atol=2e-2, rtol=2e-2), "mismatch (B=8)"

    # Ragged single tile (B not a multiple of 8) — exercises the no-pad path.
    x2 = jax.random.normal(jax.random.PRNGKey(1), (20, 256), jnp.float32)
    out2 = jax.block_until_ready(discriminator_forward(x2, params))
    assert jnp.allclose(out2, reference_forward(x2, params),
                        atol=2e-2, rtol=2e-2), "mismatch (B=20)"

    # Multi-tile with a ragged last block (small tb to keep shapes tiny).
    x3 = jax.random.normal(jax.random.PRNGKey(2), (300, 256), jnp.float32)
    out3 = jax.block_until_ready(discriminator_forward(x3, params, tb=128))
    assert jnp.allclose(out3, reference_forward(x3, params),
                        atol=2e-2, rtol=2e-2), "mismatch (B=300, tb=128)"

    print("KERNEL_OK")
</pallas_src>

<mosaic_0001>
module attributes {stable_mosaic.version = 11 : i64} {
  func.func @_mlp_kernel(%arg0: i32, %arg1: memref<8x256xf32, #tpu.memory_space<vmem>>, %arg2: memref<256x64xbf16, #tpu.memory_space<vmem>>, %arg3: memref<1x64xf32, #tpu.memory_space<vmem>>, %arg4: memref<64x64xbf16, #tpu.memory_space<vmem>>, %arg5: memref<1x64xf32, #tpu.memory_space<vmem>>, %arg6: memref<8x64xbf16, #tpu.memory_space<vmem>>, %arg7: memref<1xf32, #tpu.memory_space<smem>>, %arg8: memref<1x8xf32, #tpu.memory_space<vmem>>) attributes {dimension_semantics = [#tpu.dimension_semantics<parallel>], iteration_bounds = array<i64: 1>, scalar_prefetch = 0 : i64, scratch_operands = 0 : i64, tpu.core_type = #tpu.core_type<tc>, window_params = [{transform_indices = @transform_0, window_bounds = array<i64: 8, 256>}, {pipeline_mode = #tpu.pipeline_mode<synchronous>, transform_indices = @transform_1, window_bounds = array<i64: 256, 64>}, {pipeline_mode = #tpu.pipeline_mode<synchronous>, transform_indices = @transform_2, window_bounds = array<i64: 1, 64>}, {pipeline_mode = #tpu.pipeline_mode<synchronous>, transform_indices = @transform_3, window_bounds = array<i64: 64, 64>}, {pipeline_mode = #tpu.pipeline_mode<synchronous>, transform_indices = @transform_4, window_bounds = array<i64: 1, 64>}, {pipeline_mode = #tpu.pipeline_mode<synchronous>, transform_indices = @transform_5, window_bounds = array<i64: 8, 64>}, {transform_indices = @transform_6, window_bounds = array<i64: 1>}, {transform_indices = @transform_7, window_bounds = array<i64: 1, 8>}]} {
    %c0 = arith.constant 0 : index
    %c0_0 = arith.constant 0 : index
    %0 = vector.load %arg1[%c0, %c0_0] : memref<8x256xf32, #tpu.memory_space<vmem>>, vector<8x256xf32>
    %1 = arith.truncf %0 : vector<8x256xf32> to vector<8x256xbf16>
    %c0_1 = arith.constant 0 : index
    %c0_2 = arith.constant 0 : index
    %2 = vector.load %arg2[%c0_1, %c0_2] : memref<256x64xbf16, #tpu.memory_space<vmem>>, vector<256x64xbf16>
    %cst = arith.constant dense<0.000000e+00> : vector<8x64xf32>
    %3 = tpu.matmul %1, %2, %cst {dimension_numbers = #tpu.dot_dimension_numbers<[1], [0], [0], [1], [0, 0, 1, 1], [], []>} : vector<8x256xbf16>, vector<256x64xbf16>, vector<8x64xf32> -> vector<8x64xf32>
    %c0_3 = arith.constant 0 : index
    %c0_4 = arith.constant 0 : index
    %4 = vector.load %arg3[%c0_3, %c0_4] : memref<1x64xf32, #tpu.memory_space<vmem>>, vector<1x64xf32>
    %5 = vector.broadcast %4 : vector<1x64xf32> to vector<8x64xf32>
    %6 = arith.addf %3, %5 : vector<8x64xf32>
    %cst_5 = arith.constant 0.000000e+00 : f32
    %7 = vector.broadcast %cst_5 : f32 to vector<8x64xf32>
    %8 = arith.maximumf %6, %7 : vector<8x64xf32>
    %9 = arith.truncf %8 : vector<8x64xf32> to vector<8x64xbf16>
    %c0_6 = arith.constant 0 : index
    %c0_7 = arith.constant 0 : index
    %10 = vector.load %arg4[%c0_6, %c0_7] : memref<64x64xbf16, #tpu.memory_space<vmem>>, vector<64x64xbf16>
    %cst_8 = arith.constant dense<0.000000e+00> : vector<8x64xf32>
    %11 = tpu.matmul %9, %10, %cst_8 {dimension_numbers = #tpu.dot_dimension_numbers<[1], [0], [0], [1], [0, 0, 1, 1], [], []>} : vector<8x64xbf16>, vector<64x64xbf16>, vector<8x64xf32> -> vector<8x64xf32>
    %c0_9 = arith.constant 0 : index
    %c0_10 = arith.constant 0 : index
    %12 = vector.load %arg5[%c0_9, %c0_10] : memref<1x64xf32, #tpu.memory_space<vmem>>, vector<1x64xf32>
    %13 = vector.broadcast %12 : vector<1x64xf32> to vector<8x64xf32>
    %14 = arith.addf %11, %13 : vector<8x64xf32>
    %cst_11 = arith.constant 0.000000e+00 : f32
    %15 = vector.broadcast %cst_11 : f32 to vector<8x64xf32>
    %16 = arith.maximumf %14, %15 : vector<8x64xf32>
    %c0_12 = arith.constant 0 : index
    %c0_13 = arith.constant 0 : index
    %17 = vector.load %arg6[%c0_12, %c0_13] : memref<8x64xbf16, #tpu.memory_space<vmem>>, vector<8x64xbf16>
    %18 = arith.truncf %16 : vector<8x64xf32> to vector<8x64xbf16>
    %cst_14 = arith.constant dense<0.000000e+00> : vector<8x8xf32>
    %19 = tpu.matmul %17, %18, %cst_14 {dimension_numbers = #tpu.dot_dimension_numbers<[1], [1], [0], [0], [0, 0, 1, 0], [], []>} : vector<8x64xbf16>, vector<8x64xbf16>, vector<8x8xf32> -> vector<8x8xf32>
    %20 = vector.extract_strided_slice %19 {offsets = [0, 0], sizes = [1, 8], strides = [1, 1]} : vector<8x8xf32> to vector<1x8xf32>
    %c0_15 = arith.constant 0 : index
    %21 = memref.load %arg7[%c0_15] : memref<1xf32, #tpu.memory_space<smem>>
    %22 = vector.broadcast %21 : f32 to vector<1x8xf32>
    %23 = arith.addf %20, %22 : vector<1x8xf32>
    %cst_16 = arith.constant 0.000000e+00 : f32
    %24 = vector.broadcast %cst_16 : f32 to vector<1x8xf32>
    %25 = arith.subf %24, %23 : vector<1x8xf32>
    %26 = math.exp %25 : vector<1x8xf32>
    %cst_17 = arith.constant 1.000000e+00 : f32
    %27 = vector.broadcast %cst_17 : f32 to vector<1x8xf32>
    %28 = arith.addf %27, %26 : vector<1x8xf32>
    %29 = tpu.reciprocal %28 : vector<1x8xf32> -> vector<1x8xf32>
    %c0_18 = arith.constant 0 : index
    %c0_19 = arith.constant 0 : index
    %30 = vector.load %arg8[%c0_18, %c0_19] : memref<1x8xf32, #tpu.memory_space<vmem>>, vector<1x8xf32>
    tpu.vector_store %arg8[%c0_18, %c0_19], %29 {strides = array<i32>} : memref<1x8xf32, #tpu.memory_space<vmem>>, vector<1x8xf32>,
    return
  }
  func.func @transform_0(%arg0: i32) -> (i32, i32) {
    %c0_i32 = arith.constant 0 : i32
    %c0_i32_0 = arith.constant 0 : i32
    return %arg0, %c0_i32 : i32, i32
  }
  func.func @transform_1(%arg0: i32) -> (i32, i32) {
    %c0_i32 = arith.constant 0 : i32
    %c0_i32_0 = arith.constant 0 : i32
    %c0_i32_1 = arith.constant 0 : i32
    return %c0_i32, %c0_i32_0 : i32, i32
  }
  func.func @transform_2(%arg0: i32) -> (i32, i32) {
    %c0_i32 = arith.constant 0 : i32
    %c0_i32_0 = arith.constant 0 : i32
    %c0_i32_1 = arith.constant 0 : i32
    return %c0_i32, %c0_i32_0 : i32, i32
  }
  func.func @transform_3(%arg0: i32) -> (i32, i32) {
    %c0_i32 = arith.constant 0 : i32
    %c0_i32_0 = arith.constant 0 : i32
    %c0_i32_1 = arith.constant 0 : i32
    return %c0_i32, %c0_i32_0 : i32, i32
  }
  func.func @transform_4(%arg0: i32) -> (i32, i32) {
    %c0_i32 = arith.constant 0 : i32
    %c0_i32_0 = arith.constant 0 : i32
    %c0_i32_1 = arith.constant 0 : i32
    return %c0_i32, %c0_i32_0 : i32, i32
  }
  func.func @transform_5(%arg0: i32) -> (i32, i32) {
    %c0_i32 = arith.constant 0 : i32
    %c0_i32_0 = arith.constant 0 : i32
    %c0_i32_1 = arith.constant 0 : i32
    return %c0_i32, %c0_i32_0 : i32, i32
  }
  func.func @transform_6(%arg0: i32) -> i32 {
    %c0_i32 = arith.constant 0 : i32
    %c0_i32_0 = arith.constant 0 : i32
    return %c0_i32 : i32
  }
  func.func @transform_7(%arg0: i32) -> (i32, i32) {
    %c0_i32 = arith.constant 0 : i32
    %c0_i32_0 = arith.constant 0 : i32
    return %c0_i32, %arg0 : i32, i32
  }
}

</mosaic_0001>

<bundles_post_ra>
// kernel: tpu_custom_call.1
= control target key start
LH: loop header
LB: loop body
LE: loop exit
PB: predicated region body
PF: predicated region fallthrough
CT: control target
= control target key end

     0   :  { %v488_v2 = vmov 0.0   ;;  %s628_s0 = inlined_call_operand.vmem [shape: f32[8,256], index: 0, kind: input, shape index: {}]   ;;  %s629_s1 = inlined_call_operand.vmem [shape: bf16[256,64], index: 1, kind: input, shape index: {}]   ;;  %s630_s2 = inlined_call_operand.vmem [shape: f32[1,64], index: 2, kind: input, shape index: {}]   ;;  %s631_s3 = inlined_call_operand.vmem [shape: bf16[64,64], index: 3, kind: input, shape index: {}]   ;;  %s632_s4 = inlined_call_operand.vmem [shape: f32[1,64], index: 4, kind: input, shape index: {}]   ;;  %s633_s5 = inlined_call_operand.vmem [shape: bf16[8,64], index: 5, kind: input, shape index: {}]   ;;  %s634_s6 = inlined_call_operand.<no memory space> [shape: f32[1], index: 6, kind: input, shape index: {}]   ;;  %s635_s7 = inlined_call_operand.hbm [shape: f32[1,8], index: 7, kind: output, shape index: {}]  }
   0x1   :  { %v440_v0 = vld [vmem:[%s629_s1 + $0x40] sm:$0xff]   ;;  %419 = vmatprep.subr.bf16.mxu1 %v488_v2  ;;  %v442_v3 = vld [vmem:[%s629_s1 + $0x48] sm:$0xff]   ;;  %v444_v5 = vld [vmem:[%s629_s1 + $0x50] sm:$0xff]  }
   0x2   :  { %v441_v1 = vld [vmem:[%s629_s1] sm:$0xff]   ;;  %390 = vmatprep.subr.bf16.mxu0 %v440_v0  ;;  %v443_v4 = vld [vmem:[%s629_s1 + $0x8] sm:$0xff]   ;;  %v445_v6 = vld [vmem:[%s629_s1 + $0x10] sm:$0xff]  }
   0x3   :  { %391 = vmatpush3.bf16.msra.mxu0 %v441_v1  ;;  %v446_v7 = vld [vmem:[%s629_s1 + $0x58] sm:$0xff]   ;;  %v448_v9 = vld [vmem:[%s629_s1 + $0x60] sm:$0xff]   ;;  %v450_v11 = vld [vmem:[%s629_s1 + $0x68] sm:$0xff]  }
   0x4   :  { %392 = vmatprep.subr.bf16.mxu0 %v442_v3  ;;  %v447_v8 = vld [vmem:[%s629_s1 + $0x18] sm:$0xff]   ;;  %v449_v10 = vld [vmem:[%s629_s1 + $0x20] sm:$0xff]   ;;  %v30_v12 = vld [vmem:[%s628_s0 + $0x8] sm:$0xff] }
   0x5   :  { %v32_v13 = vpack.c.bf16 %v30_v12, %v30_v12  ;;  %v456_v14 = vld [vmem:[%s631_s3] sm:$0xff]   ;;  %v451_v15 = vld [vmem:[%s629_s1 + $0x28] sm:$0xff]   ;;  %v452_v16 = vld [vmem:[%s629_s1 + $0x70] sm:$0xff]  }
   0x6   :  { %420 = vmatpush3.bf16.msra.mxu1 %v456_v14  ;;  %v457_v17 = vld [vmem:[%s631_s3 + $0x8] sm:$0xff]  }
   0x7   :  { %393 = vmatpush3.bf16.msra.mxu0 %v443_v4  ;;  %200 = vmatprep.mubr.bf16.mxu0 %v32_v13 }
   0x8   :  { %394 = vmatprep.subr.bf16.mxu0 %v444_v5 }
   0xb   :  { %395 = vmatpush3.bf16.msra.mxu0 %v445_v6 }
   0xc   :  { %396 = vmatprep.subr.bf16.mxu0 %v446_v7 }
   0xf   :  { %397 = vmatpush3.bf16.msra.mxu0 %v447_v8 }
  0x10   :  { %398 = vmatprep.subr.bf16.mxu0 %v448_v9 }
  0x13   :  { %399 = vmatpush3.bf16.msra.mxu0 %v449_v10 }
  0x14   :  { %400 = vmatprep.subr.bf16.mxu0 %v450_v11 }
  0x15   :  { %13 = vsyncpa [#allocation4], 0  ;;  %421 = vmatprep.subr.bf16.mxu1 %v488_v2  ;;  %v453_v18 = vld [vmem:[%s629_s1 + $0x30] sm:$0xff]   ;;  %v454_v19 = vld [vmem:[%s629_s1 + $0x78] sm:$0xff]   ;;  %vm489_vm0 = vmmov 0   ;;  %vm249_vm1 = vcmask 523264   ;;  %v343_v44 = vstv %s634_s6 }
  0x16   :  { %422 = vmatpush3.bf16.msra.mxu1 %v457_v17  ;;  %v455_v20 = vld [vmem:[%s629_s1 + $0x38] sm:$0xff]   ;;  %v29_v21 = vld [vmem:[%s628_s0] sm:$0xff]  ;;  %v458_v23 = vld [vmem:[%s631_s3 + $0x10] sm:$0xff]   ;;  %427 = vmatprep.mubr.msk.bf16.mxu1 %vm489_vm0, %v488_v2  ;;  %vm350_vm2 = vcmask 57344  }
  0x17   :  { %401 = vmatpush3.bf16.msra.mxu0 %v451_v15  ;;  %423 = vmatprep.subr.bf16.mxu1 %v488_v2  ;;  %v31_v22 = vpack.c.bf16 %v29_v21, %v29_v21  ;;  %v459_v24 = vld [vmem:[%s631_s3 + $0x18] sm:$0xff]   ;;  %v366_v26 = vld [vmem:[%s630_s2] ss:$0 sm:$0xff] }
  0x18   :  { %402 = vmatprep.subr.bf16.mxu0 %v452_v16  ;;  %v383_v34 = vld [vmem:[%s632_s4] ss:$0 sm:$0xff]  ;;  %s490_s4 = smov [#allocation3]  }
  0x19   :  { %v294_v43 = vld [vmem:[%s633_s5] sm:$0xf]  ;;  %s358_s26 = sshll.u32 %s490_s4, 4  ;;  %s359_s26 = int_to_ptr.vmem [resolvable:$true] %s358_s26 }
  0x1a   :  { %424 = vmatpush3.bf16.msra.mxu1 %v458_v23  ;;  %s464_s5 = scalar_lea.vmem %s359_s26, 16  ;;  %s468_s6 = scalar_lea.vmem %s359_s26, 32 }
  0x1b   :  { %403 = vmatpush3.bf16.msra.mxu0 %v453_v18  ;;  %425 = vmatprep.subr.bf16.mxu1 %v488_v2  ;;  %p465_p0 = scmp.ne.s32.totalorder %s359_s26, %s464_s5  ;;  %p469_p1 = scmp.lt.s32.totalorder %s359_s26, %s359_s26 }
  0x1c   :  { %404 = vmatprep.subr.bf16.mxu0 %v454_v19  ;;  %p470_p2 = scmp.lt.s32.totalorder %s468_s6, %s464_s5 }
  0x1e   :  { %426 = vmatpush3.bf16.msra.mxu1 %v459_v24  ;;  %p471_p3 = por %p470_p2, %p469_p1 }
  0x1f   :  { %405 = vmatpush3.bf16.msra.mxu0 %v455_v20  ;;  %431 = vmatprep.subr.bf16.mxu1 %v488_v2 }
  0x20   :  { %p472_p4 = pnand %p471_p3, %p465_p0 }
  0x22   :  { %201 = vmatmul.mubr.bf16.vlgmr.msra.gmra.mrb[0].mxu0 %v31_v22 }
  0xf5   :  { %v406_v25 = vpop.f32.mrb[0].mxu0 }
  0xf6   :  { %v407_v27 = vpop.f32.mrb[1].mxu0 }
  0xf7   :  { %v408_v28 = vadd.f32 %v407_v27, %v406_v25  ;;  %v409_v29 = vpop.f32.mrb[2].mxu0 }
  0xf8   :  { %v410_v30 = vpop.f32.mrb[3].mxu0 }
  0xf9   :  { %v203_v31 = vadd.f32 %v408_v28, %v366_v26 }
  0xfb   :  { %v208_v32 = vmax.f32 %v203_v31, 0.0 }
  0xfd   :  { %v209_v33 = vpack.c.bf16 %v208_v32, %v208_v32 }
  0xff   :  { %428 = vmatmul.mubr.msk.bf16.vlgmr.msra.gmra.mrb[0].mxu1 %vm249_vm1, %v209_v33 }
 0x100   :  { %433 = vmatprep.mubr.msk.bf16.mxu1 %vm489_vm0, %v488_v2 }
 0x1d2   :  { %v287_v35 = vpop.f32.mrb[0].mxu1 }
 0x1d3   :  { %v288_v36 = vadd.f32 %v383_v34, %v287_v35  ;;  %v429_v37 = vpop.f32.mrb[1].mxu1 }
 0x1d4   :  { %v290_v38 = vpop.f32.mrb[2].mxu1 }
 0x1d5   :  { %v293_v39 = vmax.f32 %v288_v36, 0.0  ;;  %v430_v40 = vpop.f32.mrb[3].mxu1 }
 0x1d7   :  { %v295_v41 = vpack.c.bf16 %v293_v39, %v293_v39 }
 0x1d9   :  { %v300_v42 = vsel %vm249_vm1, %v295_v41, 0 }
 0x1da   :  { %432 = vmatpush3.bf16.xpose.msra.mxu1 %v300_v42 }
 0x1e1   :  { %434 = vmatmul.mubr.msk.bf16.vlgmr.msra.gmra.mrb[4].mxu1 %vm249_vm1, %v294_v43 }
 0x2b4   :  { %v336_v45 = vpop.f32.mrb[4].mxu1 }
 0x2b5   :  { %v344_v46 = vadd.f32 %v343_v44, %v336_v45  ;;  %v435_v47 = vpop.f32.mrb[5].mxu1 }
 0x2b6   :  { %v339_v48 = vpop.f32.mrb[6].mxu1 }
 0x2b7   :  { %v345_v49 = vsub.f32 0.0, %v344_v46  ;;  %v436_v50 = vpop.f32.mrb[7].mxu1 }
 0x2b9   :  { %v346_v51 = vmul.f32 1.442695, %v345_v49 }
 0x2bb   :  { %460 = vpow2.f32 %v346_v51 }
 0x2c5   :  { %v461_v52 = vpop.eup %460 }
 0x2c6   :  { %v348_v53 = vadd.f32 1.0, %v461_v52 }
 0x2c8   :  { %462 = vrcp.f32 %v348_v53 }
 0x2d2   :  { %v463_v54 = vpop.eup %462 }
 0x2d3   :  { %351 = vst.msk [vmem:[#allocation3] sm:$0x1] %vm350_vm2, %v463_v54 }
 0x2d4   :  { %475 = shalt.err (!%p472_p4)
}
 0x2d5   :  { %s476_s29 = scalar_lea.hbm %s635_s7, 16 }
 0x2d6   :  { %p477_p5 = scmp.ne.s32.totalorder %s635_s7, %s476_s29  ;;  %p480_p6 = scmp.lt.u32.totalorder %s476_s29, %s635_s7 }
 0x2d8   :  { %p482_p7 = pnand %p480_p6, %p477_p5 }
 0x2da   :  { %485 = shalt.err (!%p482_p7)
}
 0x2db   :  { %361 = dma.vmem_to_hbm [thread:$0]  %s359_s26, 16, %s635_s7, [#allocation4]  }
 0x2dc   :  { %486 = dma.done.wait [#allocation4], 16  }
 0x2dd   :  { %487 = vsyncadd [#allocation4], 4294967280 }
 0x2de   :  { %365 = vsyncpa [#allocation4], 1 }

</bundles_post_ra>
